<compile_context>
chip_gen: v6e
topology: v6e:2x2x1
jax: 0.10.0
libtpu: 0.0.40
codegen_flags: <defaults>
</compile_context>

<pallas_src>
import functools

import numpy as np
import jax
import jax.numpy as jnp
from jax import lax
from jax.experimental import pallas as pl
from jax.experimental.pallas import tpu as pltpu


def _avgpool_kernel(*refs, H, W, Hp, Wp, Ho, Wo, k, s, pt, pb, pw, pr,
                    padded, use_matmul, uniform, inv_scale):
    # Argument layout (all static flags):
    #   x_ref                      : (t, H, W)   unpadded input block
    #   [sw_ref]   if use_matmul   : (Wp, Wo)    banded 0/1 horizontal-sum matrix
    #   [inv_ref]  if not uniform  : (Ho, Wo)    1/valid_count table
    #   o_ref                      : (t, Ho, Wo) output block
    #   [xpad_ref] if padded       : (t, Hp, Wp) pad-slab scratch (input dtype)
    idx = 0
    x_ref = refs[idx]; idx += 1
    sw_ref = None
    if use_matmul:
        sw_ref = refs[idx]; idx += 1
    inv_ref = None
    if not uniform:
        inv_ref = refs[idx]; idx += 1
    o_ref = refs[idx]; idx += 1
    xpad_ref = refs[idx] if padded else None

    t = o_ref.shape[0]

    if padded:
        dt = x_ref.dtype
        # Zero only the thin padding border (every step; see header comment for
        # why a once-only program_id==0 guard is unsafe with core-sharded grids).
        if pt:
            xpad_ref[:, 0:pt, :] = jnp.zeros((t, pt, Wp), dt)
        if pb:
            xpad_ref[:, pt + H:Hp, :] = jnp.zeros((t, pb, Wp), dt)
        if pw:
            xpad_ref[:, :, 0:pw] = jnp.zeros((t, Hp, pw), dt)
        if pr:
            xpad_ref[:, :, pw + W:Wp] = jnp.zeros((t, Hp, pr), dt)
        # Fused zero-padding: VMEM-local interior copy, no extra HBM pass.
        xpad_ref[:, pt:pt + H, pw:pw + W] = x_ref[...]
        src = xpad_ref
    else:
        src = x_ref

    if not use_matmul:
        # stride == 1: separable shifted-add window sum, accumulated in values
        # (vregs) -> no read-modify-write scratch passes, one fused store.
        rows = src[:, :, pl.ds(0, Wo)].astype(jnp.float32)
        for dj in range(1, k):
            rows = rows + src[:, :, pl.ds(dj, Wo)].astype(jnp.float32)
        acc = rows[:, 0:Ho, :]
        for di in range(1, k):
            acc = acc + rows[:, di:di + Ho, :]
    else:
        # stride > 1: horizontal pass as a banded 0/1 matmul on the MXU (no
        # lane-strided reads); vertical stride taken on the sublane axis.
        # TODO(synk): stride > 1 path is best-effort and not exercised by the
        # demo below.
        xf = src[...].astype(jnp.float32)                       # (t, Hp, Wp)
        rows = lax.dot_general(
            xf, sw_ref[...],
            dimension_numbers=(((2,), (0,)), ((), ())),
            preferred_element_type=jnp.float32)                 # (t, Hp, Wo)
        acc = lax.slice(rows, (0, 0, 0),
                        (t, (Ho - 1) * s + 1, Wo), (1, s, 1))
        for di in range(1, k):
            acc = acc + lax.slice(rows, (0, di, 0),
                                  (t, di + (Ho - 1) * s + 1, Wo), (1, s, 1))

    # Fused divisor multiply + single output store.
    if uniform:
        o_ref[...] = (acc * jnp.float32(inv_scale)).astype(o_ref.dtype)
    else:
        o_ref[...] = (acc * inv_ref[...][None, :, :]).astype(o_ref.dtype)


def _vmem_config():
    """(tile budget bytes, vmem_limit_bytes, small_vmem?) for this chip."""
    cap = 64 << 20  # conservative fallback (v7x per-TensorCore VMEM)
    try:
        info = pltpu.get_tpu_info()
        cap = int(getattr(info, "vmem_capacity_bytes", cap))
    except Exception:
        pass
    budget = int(cap * 0.35)          # ~45 MiB on 128 MiB parts, ~22 MiB on v7x
    limit = int(cap * 0.75)           # ~96 MiB on 128 MiB parts, ~48 MiB on v7x
    small_vmem = cap <= (64 << 20)    # v7x-like: 2 TCs, halved VMEM
    return budget, limit, small_vmem


def _pick_nc_tile(NC, H, W, Hp, Wp, Ho, Wo, itemsize, padded, budget_bytes):
    """Largest divisor of N*C whose per-block VMEM footprint fits the budget."""
    per = (2 * H * W * itemsize            # double-buffered input block
           + 2 * Ho * Wo * itemsize        # double-buffered output block
           + (Hp * Wp * itemsize if padded else 0)   # fused-pad slab scratch
           + Hp * Wo * 4 + Ho * Wo * 4)    # f32 row/window value temporaries
    t = int(max(1, min(NC, budget_bytes // max(per, 1))))
    while NC % t:
        t -= 1
    return t


def avg_pool2d(x, kernel_size, stride=1, padding=0, count_include_pad=False,
               pre_pad=None):
    """AvgPool2d over NCHW input matching torch.nn.AvgPool2d semantics.

    pre_pad: optional (w_left, w_right, h_top, h_bottom) F.pad-style padding
    applied before pooling with padding=0 (padded values count as real input).
    """
    N, C, H, W = x.shape
    k, s = int(kernel_size), int(stride)

    if pre_pad is not None:
        wl, wr, ht, hb = (int(v) for v in pre_pad)
        p_int = 0
    else:
        p_int = int(padding)
        wl = wr = ht = hb = p_int

    Hp, Wp = H + ht + hb, W + wl + wr
    Ho = (Hp - k) // s + 1
    Wo = (Wp - k) // s + 1
    padded = bool(ht or hb or wl or wr)

    # Scalar-divisor fast path: uniform k*k divisor -> no 1/count table input.
    uniform = (pre_pad is not None) or count_include_pad or (p_int == 0)
    if uniform:
        inv_cnt = None
        inv_scale = 1.0 / float(k * k)
    else:
        ones = np.zeros((Hp, Wp), np.float32)
        ones[ht:ht + H, wl:wl + W] = 1.0
        cnt = np.zeros((Ho, Wo), np.float32)
        for di in range(k):
            for dj in range(k):
                cnt += ones[di:di + (Ho - 1) * s + 1:s,
                            dj:dj + (Wo - 1) * s + 1:s]
        inv_cnt = jnp.asarray(1.0 / cnt, dtype=jnp.float32)
        inv_scale = None

    use_matmul = (s != 1)

    NC = N * C
    x2 = x.reshape(NC, H, W)                       # free (contiguous) reshape
    budget, vmem_limit, small_vmem = _vmem_config()
    t = _pick_nc_tile(NC, H, W, Hp, Wp, Ho, Wo, x.dtype.itemsize, padded,
                      budget)
    if small_vmem and NC >= 2:
        # v7x-like: keep >=2 parallel grid steps so both TensorCores engage.
        t = min(t, max(1, NC // 2))
        while NC % t:
            t -= 1

    inputs = [x2]
    in_specs = [pl.BlockSpec((t, H, W), lambda i: (i, 0, 0))]
    if use_matmul:
        sw = np.zeros((Wp, Wo), np.float32)
        for wo in range(Wo):
            sw[wo * s:wo * s + k, wo] = 1.0
        inputs.append(jnp.asarray(sw))
        in_specs.append(pl.BlockSpec((Wp, Wo), lambda i: (0, 0)))
    if not uniform:
        inputs.append(inv_cnt)
        in_specs.append(pl.BlockSpec((Ho, Wo), lambda i: (0, 0)))

    scratch = []
    if padded:
        scratch.append(pltpu.VMEM((t, Hp, Wp), x.dtype))  # fused-pad slab

    kernel = functools.partial(
        _avgpool_kernel, H=H, W=W, Hp=Hp, Wp=Wp, Ho=Ho, Wo=Wo, k=k, s=s,
        pt=ht, pb=hb, pw=wl, pr=wr, padded=padded, use_matmul=use_matmul,
        uniform=uniform, inv_scale=inv_scale)

    out2 = pl.pallas_call(
        kernel,
        out_shape=jax.ShapeDtypeStruct((NC, Ho, Wo), x.dtype),
        grid_spec=pltpu.PrefetchScalarGridSpec(
            num_scalar_prefetch=0,
            grid=(NC // t,),
            in_specs=in_specs,
            out_specs=pl.BlockSpec((t, Ho, Wo), lambda i: (i, 0, 0)),
            scratch_shapes=scratch,
        ),
        compiler_params=pltpu.CompilerParams(
            dimension_semantics=("parallel",),
            vmem_limit_bytes=vmem_limit,
        ),
    )(*inputs)

    return out2.reshape(N, C, Ho, Wo)


def avg_pool2d_ref(x, kernel_size, stride=1, padding=0,
                   count_include_pad=False):
    """Pure-JAX/numpy reference (same semantics, no Pallas)."""
    N, C, H, W = x.shape
    k, s, p = kernel_size, stride, padding
    Ho = (H + 2 * p - k) // s + 1
    Wo = (W + 2 * p - k) // s + 1
    xp = jnp.pad(x.astype(jnp.float32), ((0, 0), (0, 0), (p, p), (p, p)))
    acc = jnp.zeros((N, C, Ho, Wo), jnp.float32)
    for di in range(k):
        for dj in range(k):
            acc = acc + lax.slice(
                xp, (0, 0, di, dj),
                (N, C, di + (Ho - 1) * s + 1, dj + (Wo - 1) * s + 1),
                (1, 1, s, s))
    if count_include_pad or p == 0:
        cnt = np.full((Ho, Wo), float(k * k), np.float32)
    else:
        ones = np.zeros((H + 2 * p, W + 2 * p), np.float32)
        ones[p:p + H, p:p + W] = 1.0
        cnt = np.zeros((Ho, Wo), np.float32)
        for di in range(k):
            for dj in range(k):
                cnt += ones[di:di + (Ho - 1) * s + 1:s,
                            dj:dj + (Wo - 1) * s + 1:s]
    return (acc / jnp.asarray(cnt)[None, None]).astype(x.dtype)


class AvgPool:
    """JAX/Pallas port of the PyTorch AvgPool module (NCHW)."""

    def __init__(self, C_in, C_out, shape, kernel_size, stride=1, padding=0,
                 count_include_pad=False):
        self.C_in = C_in
        self.C_out = C_out
        self.shape = shape
        self.kernel_size = kernel_size
        self.stride = stride
        self.padding = padding
        self.count_include_pad = count_include_pad
        # AvgPool has no learnable parameters.

    def __call__(self, x):
        if isinstance(self.padding, tuple):
            # Torch branch: F.pad(x, padding) then AvgPool2d(padding=0); the
            # explicitly padded values count as real inputs in the divisor.
            pad = tuple(int(v) for v in self.padding)
            if len(pad) == 2:
                pad = pad + (0, 0)
            return avg_pool2d(x, self.kernel_size, stride=self.stride,
                              padding=0,
                              count_include_pad=self.count_include_pad,
                              pre_pad=pad[:4])
        return avg_pool2d(x, self.kernel_size, stride=self.stride,
                          padding=self.padding,
                          count_include_pad=self.count_include_pad)


if __name__ == "__main__":
    key = jax.random.PRNGKey(0)
    N, C, H, W = 2, 4, 16, 16
    x = jax.random.normal(key, (N, C, H, W), dtype=jnp.float32)

    # Main case: kernel 3, stride 1, padding 1, count_include_pad=False
    # (non-uniform divisor path + fused pad slab).
    mod = AvgPool(C_in=C, C_out=C, shape=(H, W), kernel_size=3, stride=1,
                  padding=1, count_include_pad=False)
    out = jax.block_until_ready(mod(x))
    ref = avg_pool2d_ref(x, kernel_size=3, stride=1, padding=1,
                         count_include_pad=False)
    assert out.shape == (N, C, H, W), out.shape
    assert jnp.allclose(out, ref, atol=1e-5, rtol=1e-5), "mismatch (padded)"

    # Second case: padding=0 exercises the uniform-divisor fast path with no
    # pad slab and no 1/count table input.
    mod0 = AvgPool(C_in=C, C_out=C, shape=(H, W), kernel_size=3, stride=1,
                   padding=0, count_include_pad=False)
    out0 = jax.block_until_ready(mod0(x))
    ref0 = avg_pool2d_ref(x, kernel_size=3, stride=1, padding=0,
                          count_include_pad=False)
    assert out0.shape == (N, C, H - 2, W - 2), out0.shape
    assert jnp.allclose(out0, ref0, atol=1e-5, rtol=1e-5), "mismatch (nopad)"

    print("KERNEL_OK")
</pallas_src>

<mosaic_0001>
module attributes {stable_mosaic.version = 11 : i64} {
  func.func @_avgpool_kernel(%arg0: i32, %arg1: memref<4x16x16xf32, #tpu.memory_space<vmem>>, %arg2: memref<16x16xf32, #tpu.memory_space<vmem>>, %arg3: memref<4x16x16xf32, #tpu.memory_space<vmem>>, %arg4: memref<4x18x18xf32, #tpu.memory_space<vmem>>) attributes {dimension_semantics = [#tpu.dimension_semantics<parallel>], iteration_bounds = array<i64: 2>, scalar_prefetch = 0 : i64, scratch_operands = 1 : i64, tpu.core_type = #tpu.core_type<tc>, window_params = [{transform_indices = @transform_0, window_bounds = array<i64: 4, 16, 16>}, {pipeline_mode = #tpu.pipeline_mode<synchronous>, transform_indices = @transform_1, window_bounds = array<i64: 16, 16>}, {transform_indices = @transform_2, window_bounds = array<i64: 4, 16, 16>}]} {
    %cst = arith.constant 0.000000e+00 : f32
    %0 = vector.broadcast %cst : f32 to vector<4x1x18xf32>
    %c0 = arith.constant 0 : index
    %c0_0 = arith.constant 0 : index
    %c0_1 = arith.constant 0 : index
    %1 = vector.load %arg4[%c0, %c0_0, %c0_1] : memref<4x18x18xf32, #tpu.memory_space<vmem>>, vector<4x1x18xf32>
    tpu.vector_store %arg4[%c0, %c0_0, %c0_1], %0 {strides = array<i32>} : memref<4x18x18xf32, #tpu.memory_space<vmem>>, vector<4x1x18xf32>,
    %cst_2 = arith.constant 0.000000e+00 : f32
    %2 = vector.broadcast %cst_2 : f32 to vector<4x1x18xf32>
    %c0_3 = arith.constant 0 : index
    %c17 = arith.constant 17 : index
    %c0_4 = arith.constant 0 : index
    %3 = vector.load %arg4[%c0_3, %c17, %c0_4] : memref<4x18x18xf32, #tpu.memory_space<vmem>>, vector<4x1x18xf32>
    tpu.vector_store %arg4[%c0_3, %c17, %c0_4], %2 {strides = array<i32>} : memref<4x18x18xf32, #tpu.memory_space<vmem>>, vector<4x1x18xf32>,
    %cst_5 = arith.constant 0.000000e+00 : f32
    %4 = vector.broadcast %cst_5 : f32 to vector<4x18x1xf32>
    %c0_6 = arith.constant 0 : index
    %c0_7 = arith.constant 0 : index
    %c0_8 = arith.constant 0 : index
    %5 = vector.load %arg4[%c0_6, %c0_7, %c0_8] : memref<4x18x18xf32, #tpu.memory_space<vmem>>, vector<4x18x1xf32>
    tpu.vector_store %arg4[%c0_6, %c0_7, %c0_8], %4 {strides = array<i32>} : memref<4x18x18xf32, #tpu.memory_space<vmem>>, vector<4x18x1xf32>,
    %cst_9 = arith.constant 0.000000e+00 : f32
    %6 = vector.broadcast %cst_9 : f32 to vector<4x18x1xf32>
    %c0_10 = arith.constant 0 : index
    %c0_11 = arith.constant 0 : index
    %c17_12 = arith.constant 17 : index
    %7 = vector.load %arg4[%c0_10, %c0_11, %c17_12] : memref<4x18x18xf32, #tpu.memory_space<vmem>>, vector<4x18x1xf32>
    tpu.vector_store %arg4[%c0_10, %c0_11, %c17_12], %6 {strides = array<i32>} : memref<4x18x18xf32, #tpu.memory_space<vmem>>, vector<4x18x1xf32>,
    %c0_13 = arith.constant 0 : index
    %c0_14 = arith.constant 0 : index
    %c0_15 = arith.constant 0 : index
    %8 = vector.load %arg1[%c0_13, %c0_14, %c0_15] : memref<4x16x16xf32, #tpu.memory_space<vmem>>, vector<4x16x16xf32>
    %c0_16 = arith.constant 0 : index
    %c1 = arith.constant 1 : index
    %c1_17 = arith.constant 1 : index
    %9 = vector.load %arg4[%c0_16, %c1, %c1_17] : memref<4x18x18xf32, #tpu.memory_space<vmem>>, vector<4x16x16xf32>
    tpu.vector_store %arg4[%c0_16, %c1, %c1_17], %8 {strides = array<i32>} : memref<4x18x18xf32, #tpu.memory_space<vmem>>, vector<4x16x16xf32>,
    %c0_18 = arith.constant 0 : index
    %c0_19 = arith.constant 0 : index
    %c0_20 = arith.constant 0 : index
    %10 = vector.load %arg4[%c0_18, %c0_19, %c0_20] : memref<4x18x18xf32, #tpu.memory_space<vmem>>, vector<4x18x16xf32>
    %c0_21 = arith.constant 0 : index
    %c0_22 = arith.constant 0 : index
    %c1_23 = arith.constant 1 : index
    %11 = vector.load %arg4[%c0_21, %c0_22, %c1_23] : memref<4x18x18xf32, #tpu.memory_space<vmem>>, vector<4x18x16xf32>
    %12 = arith.addf %10, %11 : vector<4x18x16xf32>
    %c0_24 = arith.constant 0 : index
    %c0_25 = arith.constant 0 : index
    %c2 = arith.constant 2 : index
    %13 = vector.load %arg4[%c0_24, %c0_25, %c2] : memref<4x18x18xf32, #tpu.memory_space<vmem>>, vector<4x18x16xf32>
    %14 = arith.addf %12, %13 : vector<4x18x16xf32>
    %15 = vector.extract_strided_slice %14 {offsets = [0, 0, 0], sizes = [4, 16, 16], strides = [1, 1, 1]} : vector<4x18x16xf32> to vector<4x16x16xf32>
    %16 = vector.extract_strided_slice %14 {offsets = [0, 1, 0], sizes = [4, 16, 16], strides = [1, 1, 1]} : vector<4x18x16xf32> to vector<4x16x16xf32>
    %17 = arith.addf %15, %16 : vector<4x16x16xf32>
    %18 = vector.extract_strided_slice %14 {offsets = [0, 2, 0], sizes = [4, 16, 16], strides = [1, 1, 1]} : vector<4x18x16xf32> to vector<4x16x16xf32>
    %19 = arith.addf %17, %18 : vector<4x16x16xf32>
    %c0_26 = arith.constant 0 : index
    %c0_27 = arith.constant 0 : index
    %20 = vector.load %arg2[%c0_26, %c0_27] : memref<16x16xf32, #tpu.memory_space<vmem>>, vector<16x16xf32>
    %21 = vector.shape_cast %20 : vector<16x16xf32> to vector<1x16x16xf32>
    %22 = vector.broadcast %21 : vector<1x16x16xf32> to vector<4x16x16xf32>
    %23 = arith.mulf %19, %22 : vector<4x16x16xf32>
    %c0_28 = arith.constant 0 : index
    %c0_29 = arith.constant 0 : index
    %c0_30 = arith.constant 0 : index
    %24 = vector.load %arg3[%c0_28, %c0_29, %c0_30] : memref<4x16x16xf32, #tpu.memory_space<vmem>>, vector<4x16x16xf32>
    tpu.vector_store %arg3[%c0_28, %c0_29, %c0_30], %23 {strides = array<i32>} : memref<4x16x16xf32, #tpu.memory_space<vmem>>, vector<4x16x16xf32>,
    return
  }
  func.func @transform_0(%arg0: i32) -> (i32, i32, i32) {
    %c0_i32 = arith.constant 0 : i32
    %c0_i32_0 = arith.constant 0 : i32
    %c0_i32_1 = arith.constant 0 : i32
    return %arg0, %c0_i32, %c0_i32_0 : i32, i32, i32
  }
  func.func @transform_1(%arg0: i32) -> (i32, i32) {
    %c0_i32 = arith.constant 0 : i32
    %c0_i32_0 = arith.constant 0 : i32
    %c0_i32_1 = arith.constant 0 : i32
    return %c0_i32, %c0_i32_0 : i32, i32
  }
  func.func @transform_2(%arg0: i32) -> (i32, i32, i32) {
    %c0_i32 = arith.constant 0 : i32
    %c0_i32_0 = arith.constant 0 : i32
    %c0_i32_1 = arith.constant 0 : i32
    return %arg0, %c0_i32, %c0_i32_0 : i32, i32, i32
  }
}

</mosaic_0001>

<bundles_post_ra>
// kernel: tpu_custom_call.1
= control target key start
LH: loop header
LB: loop body
LE: loop exit
PB: predicated region body
PF: predicated region fallthrough
CT: control target
= control target key end

     0   :  { %7 = vsyncpa [#allocation4], 0  ;;  %s1142_s0 = inlined_call_operand.hbm [shape: f32[8,16,16], index: 0, kind: input, shape index: {}]   ;;  %s1143_s1 = inlined_call_operand.hbm [shape: f32[16,16], index: 1, kind: input, shape index: {}]   ;;  %s1144_s2 = inlined_call_operand.hbm [shape: f32[8,16,16], index: 2, kind: output, shape index: {}]  }
   0x1   :  { %9 = vsyncpa [#allocation4 + $0x1], 0 }
   0x2   :  { %10 = vsyncpa [#allocation7], 0 }
   0x3   :  { %11 = vsyncpa [#allocation5], 0 }
   0x4   :  { %13 = vsyncpa [#allocation5 + $0x1], 0  ;;  %s826_s9 = smov 0   ;;  %s828_s10 = smov 0  }
   0x5   :  { %s830_s11 = smov 0   ;;  %s832_s12 = smov 0  }
   0x6 LB: > { %s847_s13 = sadd.s32 4294967295, %s798_s12   ;;  %s589_s14 = sadd.s32 4294967294, %s798_s12   ;;  %s798_s12 = sphi %s832_s12, %s1166_s12   ;;  %s794_s11 = sphi %s830_s11, %s1165_s11   ;;  %s790_s10 = sphi %s828_s10, %s1164_s10   ;;  %s786_s9 = sphi %s826_s9, %s1163_s9  }
   0x7   : > { %p39_p0 = scmp.ne.s32.totalorder %s790_s10, %s786_s9  ;;  %p1145_p1 = scmp.eq.s32.totalorder %s847_s13, 0 }
   0x8   : > { %p90_p3 = scmp.eq.s32.totalorder %s589_s14, 1  ;;  %p590_p5 = scmp.ge.s32.totalorder %s798_s12, 1 }
   0x9   : > { %p856_p4 = por %p1145_p1, %p39_p0  ;;  %p97_p7 = scmp.lt.s32.totalorder %s798_s12, 3 }
   0xa   : > { %p861_p6 = por %p90_p3, %p39_p0  ;;  %s800_s18 = smov [#allocation6]  }
   0xb   : > { %s1149_s15 = scalar_select %p856_p4, 1, 0 }
   0xc   : > { %s1150_s16 = scalar_select %p861_p6, 1, 0 }
   0xd   : > { %p866_p8 = pnand %p590_p5, %p97_p7  ;;  %s109_s19 = sshll.u32 %s800_s18, 4  ;;  %s110_s19 = int_to_ptr.vmem [resolvable:$true] %s109_s19 }
   0xe   : > { %s880_s21 = sadd.s32 1, %s798_s12   ;;  %s26_s22 = sadd.s32 1, %s794_s11 }
   0xf   : > { %s1151_s17 = scalar_select %p866_p8, 1, 0 }
  0x10   : > { %p619_p9 = pneg %p866_p8  ;;  %s23_s23 = ssub.s32 %s798_s12, %s880_s21 }
  0x11   : > { %s687_s24 = scalar_lea.vmem %s110_s19, 256  ;;  %p695_p5 = scmp.lt.s32.totalorder %s110_s19, %s110_s19 }
  0x12   : > { %p875_p11 = pnand %p619_p9, %p1145_p1  ;;  %p688_p13 = scmp.ne.s32.totalorder %s110_s19, %s687_s24 }
  0x13   : > { %p696_p7 = scmp.lt.s32.totalorder %s687_s24, %s687_s24 }
  0x14   : > { %p678_p12 = pneg %p875_p11 }
  0x15   : > { %p697_p10 = por %p696_p7, %p695_p5 }
  0x16   : > { %p690_p0 = pnand %p688_p13, %p678_p12 }
  0x18   : > { %p691_p3 = pneg %p690_p0 }
  0x1a   : > { %p698_p2 = pnand %p697_p10, %p691_p3 }
  0x1c   : > { %701 = shalt.err (!%p698_p2)
}
  0x1d   : > { %s801_s25 = smov 128   ;;  %s802_s26 = smov 8  }
  0x1e   : > { %622 = dma.hbm_to_vmem [thread:$0]  (!%p875_p11), %s1143_s1, 256, %s110_s19, [#allocation7], %s801_s25, %s801_s25, %s802_s26  }
  0x1f   : > { %p24_p2 = scmp.eq.s32.totalorder %s23_s23, 0  ;;  %p33_p9 = scmp.ne.s32.totalorder %s794_s11, %s790_s10 }
  0x20   : > { %p34_p10 = scmp.eq.s32.totalorder %s798_s12, 0  ;;  %p632_p12 = scmp.lt.s32.totalorder %s798_s12, 2 }
  0x21   : > { %s900_s29 = scalar_select %p24_p2, %s794_s11, %s26_s22  }
  0x22   : > { %p35_p13 = por %p34_p10, %p33_p9  ;;  %p1153_p0 = scmp.eq.s32.totalorder %s847_s13, 1 }
  0x23   : > { %s123_s3 = sand.u32 1, %s794_s11   ;;  %s608_s4 = sshll.u32 %s798_s12, 10 }
  0x24   : > { %p904_p3 = por %p1153_p0, %p33_p9  ;;  %s593_s5 = sshll.u32 %s123_s3, 6 }
  0x25   : > { %s913_s8 = scalar_lea.hbm %s1142_s0, %s608_s4  ;;  %s127_s14 = scalar_lea.vmem [#allocation3], %s593_s5 }
  0x26   : > { %s1154_s30 = scalar_select %p904_p3, 1, 0 }
  0x27   : > { %s135_s18 = sshll.u32 %s127_s14, 4  ;;  %p915_p11 = pnand %p632_p12, %p35_p13  ;;  %s919_s18 = int_to_ptr.vmem [resolvable:$true] %s135_s18 }
  0x28   : > { %s921_s20 = scalar_lea.sflag [#allocation4], %s123_s3  ;;  %s702_s22 = scalar_lea.hbm %s913_s8, 1024 }
  0x29   : > { %p703_p5 = scmp.ne.s32.totalorder %s913_s8, %s702_s22  ;;  %p704_p7 = pneg %p915_p11 }
  0x2a   : > { %s707_s27 = scalar_lea.hbm %s1142_s0, 2048  ;;  %p708_p10 = scmp.lt.s32.totalorder %s913_s8, %s1142_s0 }
  0x2b   : > { %p705_p2 = pnand %p704_p7, %p703_p5  ;;  %p709_p12 = scmp.lt.s32.totalorder %s707_s27, %s702_s22 }
  0x2d   : > { %p706_p9 = pneg %p705_p2  ;;  %p710_p13 = por %p709_p12, %p708_p10 }
  0x2f   : > { %p711_p0 = pnand %p710_p13, %p706_p9 }
  0x31   : > { %714 = shalt.err (!%p711_p0)
}
  0x32   : > { %s715_s3 = scalar_lea.vmem %s919_s18, 1024  ;;  %s803_s5 = smov [#allocation3]  }
  0x33   : > { %p716_p1 = scmp.ne.s32.totalorder %s919_s18, %s715_s3  ;;  %s720_s6 = sshll.u32 %s803_s5, 4  ;;  %s721_s6 = int_to_ptr.vmem [resolvable:$false] %s720_s6 }
  0x34   : > { %s722_s7 = scalar_lea.vmem %s721_s6, 2048  ;;  %p723_p2 = scmp.lt.s32.totalorder %s919_s18, %s721_s6 }
  0x35   : > { %p718_p6 = pnand %p716_p1, %p704_p7  ;;  %p724_p3 = scmp.lt.s32.totalorder %s722_s7, %s715_s3 }
  0x37   : > { %p719_p5 = pneg %p718_p6  ;;  %p725_p4 = por %p724_p3, %p723_p2 }
  0x39   : > { %p726_p8 = pnand %p725_p4, %p719_p5 }
  0x3b   : > { %729 = shalt.err (!%p726_p8)
}
  0x3c   : > { %626 = dma.hbm_to_vmem [thread:$0]  (!%p915_p11), %s913_s8, 1024, %s919_s18, %s921_s20, %s801_s25, %s801_s25, %s802_s26  }
  0x3d   : > { %p1156_p1 = scmp.ne.s32.totalorder %s1151_s17, 0 }
  0x3e   : > { %s948_s14 = sand.u32 (!%p1156_p1), 1, %s790_s10   ;;  %p1157_p4 = scmp.ne.s32.totalorder (!%p1156_p1), %s1149_s15, 0 }
  0x3f   : > { %147 = sbr.rel (%p1156_p1) target bundleno = 386 (0x182), region = 28  ;;  %s598_s22 = sshll.u32 (!%p1156_p1), %s948_s14, 6 }
  0x40   : > { %s150_s23 = scalar_lea.sflag (!%p1156_p1), [#allocation4], %s948_s14  ;;  %s954_s19 = scalar_lea.vmem (!%p1156_p1), [#allocation3], %s598_s22 }
  0x44   : > { %773 = dma.done.wait (%p1157_p4), %s150_s23, 1024  }
  0x45   : > { %775 = vsyncadd (%p1157_p4), %s150_s23, 4294966272  ;;  %p1158_p6 = scmp.eq.s32.totalorder %s847_s13, 0 }
  0x47   : > { %777 = dma.done.wait (%p1158_p6), [#allocation7], 256   ;;  %p1159_p8 = pmov %p1158_p6 }
  0x48   : > { %vm180_vm0 = vcmask 139264   ;;  %vm189_vm1 = vcmask 7168   ;;  %vm203_vm2 = vcmask 146568   ;;  %v804_v0 = vmov 0.0   ;;  %v217_v1 = vld [vmem:[%s954_s19] sm:$0xff]  ;;  %v219_v2 = vld [vmem:[%s954_s19 + $0x10] sm:$0xff] }
  0x49   : > { %779 = vsyncadd (%p1159_p8), [#allocation7], 4294967040  ;;  %181 = vst.msk [vmem:[#allocation2] sm:$0x1] %vm180_vm0, %v804_v0  ;;  %vm192_vm3 = vcmask 1024   ;;  %vm206_vm4 = vcmask 140424  }
  0x4a   : > { %191 = vst.msk [vmem:[#allocation2 + $0x8] sm:$0xff] %vm189_vm1, %v804_v0  ;;  %195 = vst.msk [vmem:[#allocation2 + $0x20] sm:$0xff] %vm189_vm1, %v804_v0  ;;  %s805_s15 = smov 1   ;;  %v218_v3 = vld [vmem:[%s954_s19 + $0x8] sm:$0xff]  ;;  %v220_v4 = vld [vmem:[%s954_s19 + $0x18] sm:$0xff]  ;;  %vm257_vm5 = vcmask 138248  }
  0x4b   : > { %182 = vst.msk [vmem:[#allocation2 + $0x18] sm:$0x1] %vm180_vm0, %v804_v0  ;;  %183 = vst.msk [vmem:[#allocation2 + $0x30] sm:$0x1] %vm180_vm0, %v804_v0  ;;  %233 = vrot.lane.b32.xlu0 %v217_v1, %s805_s15  ;;  %237 = vrot.lane.b32.xlu1 %v219_v2, %s805_s15  ;;  %v221_v5 = vld [vmem:[%s954_s19 + $0x20] sm:$0xff]  ;;  %v222_v6 = vld [vmem:[%s954_s19 + $0x28] sm:$0xff] }
  0x4c   : > { %184 = vst.msk [vmem:[#allocation2 + $0x48] sm:$0x1] %vm180_vm0, %v804_v0  ;;  %185 = vst.msk [vmem:[#allocation2 + $0x11] sm:$0x1] %vm180_vm0, %v804_v0  ;;  %v224_v7 = vld [vmem:[%s954_s19 + $0x38] sm:$0xff]  ;;  %v223_v8 = vld [vmem:[%s954_s19 + $0x30] sm:$0xff] }
  0x4d   : > { %186 = vst.msk [vmem:[#allocation2 + $0x29] sm:$0x1] %vm180_vm0, %v804_v0  ;;  %187 = vst.msk [vmem:[#allocation2 + $0x41] sm:$0x1] %vm180_vm0, %v804_v0  ;;  %s806_s17 = smov 127   ;;  %s807_s25 = smov 126  }
  0x4e   : > { %188 = vst.msk [vmem:[#allocation2 + $0x59] sm:$0x1] %vm180_vm0, %v804_v0  ;;  %vm398_vm6 = vcmask 1046528   ;;  %vm435_vm7 = vcmask 1045504   ;;  %vm482_vm8 = vcmask 130048   ;;  %s1051_s26 = scalar_lea.vmem [#allocation8], %s598_s22 }
  0x4f   : > { %198 = vst.msk [vmem:[#allocation2 + $0x38] sm:$0xff] %vm189_vm1, %v804_v0  ;;  %201 = vst.msk [vmem:[#allocation2 + $0x50] sm:$0xff] %vm189_vm1, %v804_v0  ;;  %235 = vrot.lane.b32.xlu0 %v218_v3, %s805_s15  ;;  %239 = vrot.lane.b32.xlu1 %v220_v4, %s805_s15  ;;  %v1037_v3 = vld [vmem:[#allocation6] sm:$0xff]  ;;  %s610_s8 = sshll.u32 %s847_s13, 10  ;;  %s506_s18 = sshll.u32 %s1051_s26, 4  ;;  %s1094_s18 = int_to_ptr.vmem [resolvable:$true] %s506_s18 }
  0x50   : > { %190 = vst.msk [vmem:[#allocation2] sm:$0xff] %vm189_vm1, %v804_v0  ;;  %194 = vst.msk [vmem:[#allocation2 + $0x18] sm:$0xff] %vm189_vm1, %v804_v0  ;;  %s1092_s27 = scalar_lea.hbm %s1144_s2, %s610_s8  ;;  %s492_s13 = scalar_lea.sflag [#allocation5], %s948_s14 }
  0x51   : > { %205 = vst.msk [vmem:[#allocation2 + $0x8] sm:$0xff] %vm203_vm2, %v804_v0  ;;  %209 = vst.msk [vmem:[#allocation2 + $0x20] sm:$0xff] %vm203_vm2, %v804_v0  ;;  %s730_s28 = scalar_lea.vmem %s1094_s18, 1024  ;;  %p1160_p11 = scmp.ne.s32.totalorder %s1154_s30, 0 }
  0x52   : > { %197 = vst.msk [vmem:[#allocation2 + $0x30] sm:$0xff] %vm189_vm1, %v804_v0  ;;  %200 = vst.msk [vmem:[#allocation2 + $0x48] sm:$0xff] %vm189_vm1, %v804_v0  ;;  %p731_p3 = scmp.ne.s32.totalorder %s1094_s18, %s730_s28  ;;  %s808_s4 = smov [#allocation8]  }
  0x53   : > { %212 = vst.msk [vmem:[#allocation2 + $0x38] sm:$0xff] %vm203_vm2, %v804_v0  ;;  %215 = vst.msk [vmem:[#allocation2 + $0x50] sm:$0xff] %vm203_vm2, %v804_v0  ;;  %241 = vrot.lane.b32.xlu0 %v221_v5, %s805_s15  ;;  %243 = vrot.lane.b32.xlu1 %v222_v6, %s805_s15  ;;  %v1040_v5 = vld [vmem:[#allocation6 + $0x8] sm:$0xff]  ;;  %s734_s3 = sshll.u32 %s808_s4, 4  ;;  %s735_s3 = int_to_ptr.vmem [resolvable:$false] %s734_s3 }
  0x54   : > { %193 = vst.msk [vmem:[#allocation2 + $0x10] sm:$0x3] %vm192_vm3, %v804_v0  ;;  %196 = vst.msk [vmem:[#allocation2 + $0x28] sm:$0x3] %vm192_vm3, %v804_v0  ;;  %p732_p7 = pnand %p731_p3, %p1160_p11  ;;  %s736_s5 = scalar_lea.vmem %s735_s3, 2048 }
  0x55   : > { %199 = vst.msk [vmem:[#allocation2 + $0x40] sm:$0x3] %vm192_vm3, %v804_v0  ;;  %202 = vst.msk [vmem:[#allocation2 + $0x58] sm:$0x3] %vm192_vm3, %v804_v0  ;;  %p737_p10 = scmp.lt.s32.totalorder %s1094_s18, %s735_s3  ;;  %p738_p12 = scmp.lt.s32.totalorder %s736_s5, %s730_s28 }
  0x56   : > { %204 = vst.msk [vmem:[#allocation2] sm:$0xff] %vm203_vm2, %v804_v0  ;;  %208 = vst.msk [vmem:[#allocation2 + $0x18] sm:$0xff] %vm203_vm2, %v804_v0  ;;  %p733_p9 = pneg %p732_p7 }
  0x57   : > { %207 = vst.msk [vmem:[#allocation2 + $0x10] sm:$0x3] %vm206_vm4, %v804_v0  ;;  %210 = vst.msk [vmem:[#allocation2 + $0x28] sm:$0x3] %vm206_vm4, %v804_v0  ;;  %247 = vrot.lane.b32.xlu1 %v224_v7, %s805_s15  ;;  %245 = vrot.lane.b32.xlu0 %v223_v8, %s805_s15  ;;  %p739_p13 = por %p738_p12, %p737_p10 }
  0x58   : > { %211 = vst.msk [vmem:[#allocation2 + $0x30] sm:$0xff] %vm203_vm2, %v804_v0  ;;  %214 = vst.msk [vmem:[#allocation2 + $0x48] sm:$0xff] %vm203_vm2, %v804_v0 }
  0x59   : > { %213 = vst.msk [vmem:[#allocation2 + $0x40] sm:$0x3] %vm206_vm4, %v804_v0  ;;  %216 = vst.msk [vmem:[#allocation2 + $0x58] sm:$0x3] %vm206_vm4, %v804_v0  ;;  %p740_p0 = pnand %p739_p13, %p733_p9 }
  0xbd   : > { %v234_v9 = vpop.permute.xlu0 %233  ;;  %v238_v10 = vpop.permute.xlu1 %237 }
  0xbe   : > { %258 = vst.msk [vmem:[#allocation2 + $0x1] sm:$0xff] %vm257_vm5, %v234_v9  ;;  %260 = vst.msk [vmem:[#allocation2 + $0x19] sm:$0xff] %vm257_vm5, %v238_v10 }
  0xc1   : > { %v236_v11 = vpop.permute.xlu0 %235  ;;  %v240_v12 = vpop.permute.xlu1 %239 }
  0xc2   : > { %259 = vst.msk [vmem:[#allocation2 + $0x9] sm:$0xff] %vm257_vm5, %v236_v11  ;;  %261 = vst.msk [vmem:[#allocation2 + $0x21] sm:$0xff] %vm257_vm5, %v240_v12 }
  0xc5   : > { %v266_v13 = vld [vmem:[#allocation2] sm:$0xff]  ;;  %v242_v14 = vpop.permute.xlu0 %241  ;;  %v244_v15 = vpop.permute.xlu1 %243  ;;  %v269_v20 = vld [vmem:[#allocation2 + $0x18] sm:$0xff] }
  0xc6   : > { %290 = vrot.lane.b32.xlu0 %v266_v13, %s806_s17  ;;  %262 = vst.msk [vmem:[#allocation2 + $0x31] sm:$0xff] %vm257_vm5, %v242_v14  ;;  %263 = vst.msk [vmem:[#allocation2 + $0x39] sm:$0xff] %vm257_vm5, %v244_v15 }
  0xc9   : > { %v267_v16 = vld [vmem:[#allocation2 + $0x8] sm:$0xff]  ;;  %v268_v17 = vld [vmem:[#allocation2 + $0x10] sm:$0x3]  ;;  %v248_v18 = vpop.permute.xlu1 %247  ;;  %v246_v19 = vpop.permute.xlu0 %245  ;;  %v270_v21 = vld [vmem:[#allocation2 + $0x20] sm:$0xff] }
  0xca   : > { %292 = vrot.lane.b32.xlu1 %v267_v16, %s806_s17  ;;  %294 = vrot.lane.b32.xlu0 %v268_v17, %s806_s17  ;;  %265 = vst.msk [vmem:[#allocation2 + $0x51] sm:$0xff] %vm257_vm5, %v248_v18  ;;  %264 = vst.msk [vmem:[#allocation2 + $0x49] sm:$0xff] %vm257_vm5, %v246_v19  ;;  %v1000_v22 = vld [vmem:[#allocation2 + $0x28] sm:$0x3] }
  0xcd   : > { %v1002_v23 = vld [vmem:[#allocation2 + $0x30] sm:$0xff]  ;;  %v1006_v24 = vld [vmem:[#allocation2 + $0x38] sm:$0xff]  ;;  %v1008_v25 = vld [vmem:[#allocation2 + $0x40] sm:$0x3] }
  0xce   : > { %296 = vrot.lane.b32.xlu1 %v269_v20, %s806_s17  ;;  %298 = vrot.lane.b32.xlu0 %v270_v21, %s806_s17 }
  0xd1   : > { %v1012_v26 = vld [vmem:[#allocation2 + $0x48] sm:$0xff]  ;;  %v1014_v27 = vld [vmem:[#allocation2 + $0x50] sm:$0xff]  ;;  %v1018_v28 = vld [vmem:[#allocation2 + $0x58] sm:$0x3] }
  0xd2   : > { %300 = vrot.lane.b32.xlu1 %v1000_v22, %s806_s17  ;;  %302 = vrot.lane.b32.xlu0 %v1002_v23, %s806_s17 }
  0xd6   : > { %304 = vrot.lane.b32.xlu1 %v1006_v24, %s806_s17  ;;  %306 = vrot.lane.b32.xlu0 %v1008_v25, %s806_s17 }
  0xda   : > { %308 = vrot.lane.b32.xlu1 %v1012_v26, %s806_s17  ;;  %310 = vrot.lane.b32.xlu0 %v1014_v27, %s806_s17 }
  0xde   : > { %312 = vrot.lane.b32.xlu1 %v1018_v28, %s806_s17  ;;  %338 = vrot.lane.b32.xlu0 %v266_v13, %s807_s25 }
  0xe2   : > { %340 = vrot.lane.b32.xlu1 %v267_v16, %s807_s25  ;;  %342 = vrot.lane.b32.xlu0 %v268_v17, %s807_s25 }
  0xe6   : > { %344 = vrot.lane.b32.xlu1 %v269_v20, %s807_s25  ;;  %346 = vrot.lane.b32.xlu0 %v270_v21, %s807_s25 }
  0xea   : > { %348 = vrot.lane.b32.xlu1 %v1000_v22, %s807_s25  ;;  %350 = vrot.lane.b32.xlu0 %v1002_v23, %s807_s25 }
  0xee   : > { %352 = vrot.lane.b32.xlu1 %v1006_v24, %s807_s25  ;;  %354 = vrot.lane.b32.xlu0 %v1008_v25, %s807_s25 }
  0xf2   : > { %356 = vrot.lane.b32.xlu1 %v1012_v26, %s807_s25  ;;  %358 = vrot.lane.b32.xlu0 %v1014_v27, %s807_s25 }
  0xf6   : > { %360 = vrot.lane.b32.xlu1 %v1018_v28, %s807_s25 }
 0x138   : > { %v291_v29 = vpop.permute.xlu0 %290 }
 0x139   : > { %v326_v40 = vadd.f32 %v291_v29, %v266_v13 }
 0x13c   : > { %v293_v30 = vpop.permute.xlu1 %292  ;;  %v295_v31 = vpop.permute.xlu0 %294 }
 0x13d   : > { %v327_v44 = vadd.f32 %v293_v30, %v267_v16  ;;  %v328_v45 = vadd.f32 %v295_v31, %v268_v17 }
 0x140   : > { %v297_v32 = vpop.permute.xlu1 %296  ;;  %v299_v33 = vpop.permute.xlu0 %298 }
 0x141   : > { %v329_v55 = vadd.f32 %v297_v32, %v269_v20  ;;  %v330_v56 = vadd.f32 %v299_v33, %v270_v21 }
 0x144   : > { %v301_v34 = vpop.permute.xlu1 %300  ;;  %v303_v35 = vpop.permute.xlu0 %302 }
 0x145   : > { %v331_v2 = vadd.f32 %v301_v34, %v1000_v22  ;;  %v332_v7 = vadd.f32 %v303_v35, %v1002_v23 }
 0x148   : > { %v305_v36 = vpop.permute.xlu1 %304  ;;  %v307_v37 = vpop.permute.xlu0 %306 }
 0x149   : > { %v333_v17 = vadd.f32 %v305_v36, %v1006_v24  ;;  %v334_v21 = vadd.f32 %v307_v37, %v1008_v25 }
 0x14c   : > { %v1028_v38 = vpop.permute.xlu1 %308  ;;  %v1030_v39 = vpop.permute.xlu0 %310 }
 0x150   : > { %v1032_v41 = vpop.permute.xlu1 %312  ;;  %v339_v42 = vpop.permute.xlu0 %338 }
 0x151   : > { %v374_v43 = vadd.f32 %v339_v42, %v326_v40 }
 0x153   : > { %v399_v50 = vrot.slane %v374_v43, 1  ;;  %v436_v59 = vrot.slane %v374_v43, 2 }
 0x154   : > { %v341_v46 = vpop.permute.xlu1 %340  ;;  %v343_v47 = vpop.permute.xlu0 %342 }
 0x155   : > { %v375_v48 = vadd.f32 %v341_v46, %v327_v44  ;;  %v376_v49 = vadd.f32 %v343_v47, %v328_v45  ;;  %v335_v46 = vadd.f32 %v1028_v38, %v1012_v26 }
 0x157   : > { %v400_v51 = vrot.slane %v375_v48, 1  ;;  %v437_v52 = vrot.slane %v375_v48, 2  ;;  %v402_v53 = vrot.slane %v376_v49, 1  ;;  %v439_v54 = vrot.slane %v376_v49, 2 }
 0x158   : > { %v345_v57 = vpop.permute.xlu1 %344  ;;  %v347_v58 = vpop.permute.xlu0 %346 }
 0x159   : > { %v401_v60 = vsel %vm398_vm6, %v399_v50, %v400_v51  ;;  %v403_v61 = vsel %vm398_vm6, %v400_v51, %v402_v53  ;;  %v377_v0 = vadd.f32 %v345_v57, %v329_v55  ;;  %v378_v1 = vadd.f32 %v347_v58, %v330_v56 }
 0x15a   : > { %v427_v62 = vadd.f32 %v401_v60, %v374_v43  ;;  %v428_v63 = vadd.f32 %v403_v61, %v375_v48  ;;  %v438_v4 = vsel %vm435_vm7, %v436_v59, %v437_v52  ;;  %v440_v6 = vsel %vm435_vm7, %v437_v52, %v439_v54 }
 0x15b   : > { %v404_v10 = vrot.slane %v377_v0, 1  ;;  %v441_v13 = vrot.slane %v377_v0, 2  ;;  %v405_v14 = vrot.slane %v378_v1, 1  ;;  %v442_v15 = vrot.slane %v378_v1, 2 }
 0x15c   : > { %v464_v8 = vadd.f32 %v438_v4, %v427_v62  ;;  %v465_v9 = vadd.f32 %v440_v6, %v428_v63  ;;  %v349_v11 = vpop.permute.xlu1 %348  ;;  %v351_v12 = vpop.permute.xlu0 %350  ;;  %v336_v51 = vadd.f32 %v1030_v39, %v1014_v27  ;;  %v337_v57 = vadd.f32 %v1032_v41, %v1018_v28 }
 0x15d   : > { %v379_v16 = vadd.f32 %v349_v11, %v331_v2  ;;  %v380_v20 = vadd.f32 %v351_v12, %v332_v7  ;;  %v406_v22 = vsel %vm398_vm6, %v404_v10, %v405_v14  ;;  %v443_v32 = vsel %vm435_vm7, %v441_v13, %v442_v15 }
 0x15e   : > { %v474_v18 = vmul.f32 %v1037_v3, %v464_v8  ;;  %v475_v19 = vmul.f32 %v1040_v5, %v465_v9  ;;  %v429_v24 = vadd.f32 %v406_v22, %v377_v0 }
 0x15f   : > { %v407_v23 = vrot.slane %v379_v16, 1  ;;  %v444_v29 = vrot.slane %v379_v16, 2  ;;  %v409_v40 = vrot.slane %v380_v20, 1  ;;  %v446_v52 = vrot.slane %v380_v20, 2 }
 0x160   : > { %483 = vst.msk [vmem:[%s1051_s26] sm:$0xff] %vm482_vm8, %v474_v18  ;;  %484 = vst.msk [vmem:[%s1051_s26 + $0x8] sm:$0xff] %vm482_vm8, %v475_v19  ;;  %v353_v30 = vpop.permute.xlu1 %352  ;;  %v355_v31 = vpop.permute.xlu0 %354  ;;  %v466_v35 = vadd.f32 %v443_v32, %v429_v24 }
 0x161   : > { %v408_v25 = vsel %vm398_vm6, %v405_v14, %v407_v23  ;;  %v381_v33 = vadd.f32 %v353_v30, %v333_v17  ;;  %v382_v34 = vadd.f32 %v355_v31, %v334_v21  ;;  %v445_v37 = vsel %vm435_vm7, %v442_v15, %v444_v29 }
 0x162   : > { %v430_v36 = vadd.f32 %v408_v25, %v378_v1  ;;  %v476_v47 = vmul.f32 %v1037_v3, %v466_v35 }
 0x163   : > { %v410_v42 = vrot.slane %v381_v33, 1  ;;  %v447_v43 = vrot.slane %v381_v33, 2  ;;  %v412_v44 = vrot.slane %v382_v34, 1  ;;  %v449_v45 = vrot.slane %v382_v34, 2 }
 0x164   : > { %v467_v48 = vadd.f32 %v445_v37, %v430_v36  ;;  %v357_v49 = vpop.permute.xlu1 %356  ;;  %v359_v50 = vpop.permute.xlu0 %358  ;;  %485 = vst.msk [vmem:[%s1051_s26 + $0x10] sm:$0xff] %vm482_vm8, %v476_v47 }
 0x165   : > { %v411_v53 = vsel %vm398_vm6, %v409_v40, %v410_v42  ;;  %v413_v54 = vsel %vm398_vm6, %v410_v42, %v412_v44  ;;  %v383_v38 = vadd.f32 %v357_v49, %v335_v46  ;;  %v448_v58 = vsel %vm435_vm7, %v446_v52, %v447_v43 }
 0x166   : > { %v477_v55 = vmul.f32 %v1040_v5, %v467_v48  ;;  %v431_v56 = vadd.f32 %v411_v53, %v380_v20  ;;  %v432_v26 = vadd.f32 %v413_v54, %v381_v33  ;;  %v450_v59 = vsel %vm435_vm7, %v447_v43, %v449_v45 }
 0x167   : > { %v384_v27 = vadd.f32 %v359_v50, %v336_v51  ;;  %v414_v61 = vrot.slane %v383_v38, 1  ;;  %v451_v63 = vrot.slane %v383_v38, 2 }
 0x168   : > { %486 = vst.msk [vmem:[%s1051_s26 + $0x18] sm:$0xff] %vm482_vm8, %v477_v55  ;;  %v468_v39 = vadd.f32 %v448_v58, %v431_v56  ;;  %v469_v60 = vadd.f32 %v450_v59, %v432_v26  ;;  %v361_v62 = vpop.permute.xlu1 %360 }
 0x169   : > { %v415_v0 = vrot.slane %v384_v27, 1  ;;  %v452_v1 = vrot.slane %v384_v27, 2  ;;  %v385_v2 = vadd.f32 %v361_v62, %v337_v57 }
 0x16a   : > { %v478_v28 = vmul.f32 %v1037_v3, %v468_v39  ;;  %v479_v41 = vmul.f32 %v1040_v5, %v469_v60 }
 0x16b   : > { %v416_v4 = vsel %vm398_vm6, %v414_v61, %v415_v0  ;;  %v417_v6 = vrot.slane %v385_v2, 1  ;;  %v454_v7 = vrot.slane %v385_v2, 2  ;;  %v453_v9 = vsel %vm435_vm7, %v451_v63, %v452_v1 }
 0x16c   : > { %487 = vst.msk [vmem:[%s1051_s26 + $0x20] sm:$0xff] %vm482_vm8, %v478_v28  ;;  %488 = vst.msk [vmem:[%s1051_s26 + $0x28] sm:$0xff] %vm482_vm8, %v479_v41  ;;  %v433_v8 = vadd.f32 %v416_v4, %v383_v38 }
 0x16d   : > { %v418_v10 = vsel %vm398_vm6, %v415_v0, %v417_v6  ;;  %v455_v13 = vsel %vm435_vm7, %v452_v1, %v454_v7 }
 0x16e   : > { %v470_v11 = vadd.f32 %v453_v9, %v433_v8  ;;  %v434_v12 = vadd.f32 %v418_v10, %v384_v27 }
 0x170   : > { %v480_v14 = vmul.f32 %v1037_v3, %v470_v11  ;;  %v471_v15 = vadd.f32 %v455_v13, %v434_v12 }
 0x172   : > { %489 = vst.msk [vmem:[%s1051_s26 + $0x30] sm:$0xff] %vm482_vm8, %v480_v14  ;;  %v481_v16 = vmul.f32 %v1040_v5, %v471_v15 }
 0x174   : > { %490 = vst.msk [vmem:[%s1051_s26 + $0x38] sm:$0xff] %vm482_vm8, %v481_v16 }
 0x175   : > { %743 = shalt.err (!%p740_p0)
}
 0x176   : > { %s744_s6 = scalar_lea.hbm %s1092_s27, 1024  ;;  %s748_s23 = scalar_lea.hbm %s1144_s2, 2048 }
 0x177   : > { %p745_p5 = scmp.ne.s32.totalorder %s1092_s27, %s744_s6  ;;  %p749_p4 = scmp.lt.s32.totalorder %s1092_s27, %s1144_s2 }
 0x178   : > { %p750_p6 = scmp.lt.s32.totalorder %s748_s23, %s744_s6 }
 0x179   : > { %p746_p2 = pnand %p745_p5, %p1160_p11 }
 0x17a   : > { %p751_p8 = por %p750_p6, %p749_p4 }
 0x17b   : > { %p747_p1 = pneg %p746_p2 }
 0x17d   : > { %p752_p3 = pnand %p751_p8, %p747_p1 }
 0x17f   : > { %755 = shalt.err (!%p752_p3)
}
 0x180   : > { %s809_s17 = smov 128   ;;  %s810_s25 = smov 8  }
 0x181   : > { %617 = dma.vmem_to_hbm [thread:$0]  (%p1160_p11), %s1094_s18, 1024, %s1092_s27, %s492_s13, %s809_s17, %s809_s17, %s810_s25  }
 0x182 PF: > { %s521_s26 = sand.u32 1, %s786_s9   ;;  %p1161_p7 = scmp.ne.s32.totalorder %s1150_s16, 0 }
 0x183   : > { %p1162_p9 = scmp.ge.s32.totalorder %s798_s12, 2  ;;  %s522_s8 = scalar_lea.sflag [#allocation5], %s521_s26 }
 0x185   : > { %p628_p10 = pnand %p1162_p9, %p1161_p7 }
 0x187   : > { %p629_p12 = pneg %p628_p10 }
 0x189   : > { %781 = dma.done.wait (%p629_p12), %s522_s8, 1024  }
 0x18a   : > { %783 = vsyncadd (%p629_p12), %s522_s8, 4294966272  ;;  %p16_p13 = scmp.ge.s32.totalorder %s880_s21, 4   ;;  %s1163_s9 = smov %s790_s10 }
 0x18b   : > { %s1164_s10 = smov %s794_s11  ;;  %s1165_s11 = smov %s900_s29 }
 0x18c   : > { %s1166_s12 = smov %s880_s21  ;;  %18 = sbr.rel (!%p16_p13) target bundleno = 6 (0x6), region = 77 }
 0x191   :  { %527 = vsyncpa [#allocation4], 1 }
 0x192   :  { %529 = vsyncpa [#allocation4 + $0x1], 1 }
 0x193   :  { %530 = vsyncpa [#allocation7], 1 }
 0x194   :  { %531 = vsyncpa [#allocation5], 1 }
 0x195   :  { %533 = vsyncpa [#allocation5 + $0x1], 1 }

</bundles_post_ra>
